<compile_context>
chip_gen: v5e
topology: v5e:2x2
jax: 0.10.0
libtpu: 0.0.40
codegen_flags: <defaults>
</compile_context>

<pallas_src>
import functools

import jax
import jax.numpy as jnp
from jax.experimental import pallas as pl
from jax.experimental.pallas import tpu as pltpu


def simple_cnn_kernel(x_ref, w_ref, bconv_ref, wl_ref, blin_ref, o_ref):
    """One batch tile of the fused forward pass (all f32, no scratch refs).

    x_ref    : (bt, C*L)    f32  native-layout input tile, lane index = c*L + t
    w_ref    : (C*L, OC*L)  f32  banded conv weight (im2col folded into weights)
    bconv_ref: (1, OC*L)    f32  conv bias, replicated over t
    wl_ref   : (1, OC*L)    f32  linear weight * (1/L), replicated over t
    blin_ref : (1, 1)       f32  linear bias
    o_ref    : (1, bt)      f32  lane-dense output tile (one scalar per batch row)
    """
    # Entire Conv1d(k=3, padding=1) as one f32 MXU contraction: K=C*L, N=OC*L.
    y = jnp.dot(x_ref[...], w_ref[...], preferred_element_type=jnp.float32)
    # Bias + ReLU + (AdaptiveAvgPool1d(1) . Linear(32,1)) folded per lane:
    #   out[b] = sum_{o,t} relu(y[b,o,t] + b_conv[o]) * w_lin[o] / L + b_lin
    z = jnp.maximum(y + bconv_ref[...], 0.0) * wl_ref[...]
    o_ref[...] = jnp.sum(z, axis=-1)[None, :] + blin_ref[...]


def _pick_batch_tiling(batch, bt_cap):
    """bt is a multiple of 128 (lane-dense output rows); a single tile whenever the
    batch fits (v5e/v6e: 1 TC, extra steps are pure overhead); an even tile count
    when more than one tile is needed (v7x: 2 TCs share the 'parallel' axis)."""
    bt_cap = max(128, (bt_cap // 128) * 128)
    b128 = ((batch + 127) // 128) * 128
    n_tiles = max(1, -(-b128 // bt_cap))
    if n_tiles > 1 and n_tiles % 2 == 1:
        n_tiles += 1
    bt = ((-(-batch // n_tiles) + 127) // 128) * 128
    return bt, n_tiles


@functools.partial(jax.jit, static_argnames=("block_b",))
def simple_cnn_forward(x_ncl, w_conv, b_conv, w_lin, b_lin, *, block_b=512):
    """x_ncl: (B, C, L) f32; identical semantics to SimpleCNN.forward -> (B,) f32."""
    B, C, L = x_ncl.shape
    OC = w_conv.shape[0]
    CL, OCL = C * L, OC * L

    # block_b >= 256 also keeps each MXU push M-full on v6e/v7x (2x256^2 MXUs).
    bt, n_tiles = _pick_batch_tiling(B, block_b)
    Bp = bt * n_tiles

    # ---- Operand prep. x is only reshaped (contiguous minor-dim collapse ->
    # ---- free under jit): no transpose, no dtype cast, no separate HBM pass.
    x_flat = x_ncl.astype(jnp.float32).reshape(B, CL)
    if Bp != B:
        # Zero batch rows only (yield harmless relu(bias) garbage, sliced off below).
        x_flat = jnp.pad(x_flat, ((0, Bp - B), (0, 0)))

    # Banded conv weight: W_big[c*L+s, o*L+t] = w_conv[o, c, s-t+1] when |s-t|<=1.
    s_idx = jnp.arange(L)[:, None]
    t_idx = jnp.arange(L)[None, :]
    kmat = s_idx - t_idx + 1                                       # (L, L)
    valid = (kmat >= 0) & (kmat <= 2)
    w_kco = jnp.transpose(w_conv.astype(jnp.float32), (2, 1, 0))   # (3, C, OC)
    g = w_kco[jnp.clip(kmat, 0, 2)]                                # (L, L, C, OC)
    g = jnp.where(valid[:, :, None, None], g, 0.0)
    w_big = jnp.transpose(g, (2, 0, 3, 1)).reshape(CL, OCL)        # (C*L, OC*L)

    bconv_big = jnp.repeat(b_conv.astype(jnp.float32), L).reshape(1, OCL)
    wl_big = jnp.repeat(w_lin.astype(jnp.float32).reshape(-1) / L, L).reshape(1, OCL)
    b_l = b_lin.astype(jnp.float32).reshape(1, 1)

    # ---- VMEM accounting (f32 bytes): double-buffered x tile + resident weights
    # ---- + small operands + compiler-held (bt, OC*L) matmul result (x2 slack).
    est_bytes = 4 * (2 * bt * CL + 2 * CL * OCL + 4 * OCL + 2 * bt + 2 * bt * OCL)
    vmem_limit = min(max(2 * est_bytes, 16 * 1024 * 1024), 32 * 1024 * 1024)

    cost = pl.CostEstimate(
        flops=2 * Bp * CL * OCL + 4 * Bp * OCL,
        transcendentals=0,
        bytes_accessed=4 * (Bp * CL + CL * OCL + 2 * OCL + 1 + Bp),
    )

    out = pl.pallas_call(
        simple_cnn_kernel,
        out_shape=jax.ShapeDtypeStruct((1, Bp), jnp.float32),
        grid_spec=pltpu.PrefetchScalarGridSpec(
            num_scalar_prefetch=0,
            grid=(n_tiles,),
            in_specs=[
                pl.BlockSpec((bt, CL), lambda i: (i, 0)),     # streamed batch tile
                pl.BlockSpec((CL, OCL), lambda i: (0, 0)),    # VMEM-resident weights
                pl.BlockSpec((1, OCL), lambda i: (0, 0)),
                pl.BlockSpec((1, OCL), lambda i: (0, 0)),
                pl.BlockSpec((1, 1), lambda i: (0, 0)),
            ],
            out_specs=pl.BlockSpec((1, bt), lambda i: (0, i)),  # lane-dense output
        ),
        compiler_params=pltpu.CompilerParams(
            dimension_semantics=("parallel",),   # batch tiles shard over v7x's 2 TCs
            vmem_limit_bytes=vmem_limit,
        ),
        cost_estimate=cost,
    )(x_flat, w_big, bconv_big, wl_big, b_l)
    return out[0, :B]                                              # .squeeze(-1)


def reference_forward(x_ncl, w_conv, b_conv, w_lin, b_lin):
    """Pure-JAX f32 reference with torch Conv1d/AvgPool/Linear semantics."""
    B, C, L = x_ncl.shape
    x_blc = jnp.transpose(x_ncl, (0, 2, 1))
    xpad = jnp.pad(x_blc, ((0, 0), (1, 1), (0, 0)))
    w_kco = jnp.transpose(w_conv, (2, 1, 0))                       # (3, C, OC)
    y = sum(jnp.einsum("btc,co->bto", xpad[:, k:k + L, :], w_kco[k]) for k in range(3))
    y = jnp.maximum(y + b_conv[None, None, :], 0.0)
    pooled = jnp.mean(y, axis=1)
    return pooled @ w_lin[0] + b_lin[0]


if __name__ == "__main__":
    # Small shapes consistent with the module: n_feat=4, seq_len=16, 32 conv channels.
    B, N_FEAT, L, OC = 16, 4, 16, 32
    key = jax.random.PRNGKey(0)
    kx, kw1, kb1, kw2, kb2 = jax.random.split(key, 5)

    x = jax.random.normal(kx, (B, N_FEAT, L), dtype=jnp.float32)
    w_conv = jax.random.normal(kw1, (OC, N_FEAT, 3), dtype=jnp.float32) * 0.1
    b_conv = jax.random.normal(kb1, (OC,), dtype=jnp.float32) * 0.1
    w_lin = jax.random.normal(kw2, (1, OC), dtype=jnp.float32) * 0.1
    b_lin = jax.random.normal(kb2, (1,), dtype=jnp.float32) * 0.1

    out = jax.block_until_ready(simple_cnn_forward(x, w_conv, b_conv, w_lin, b_lin))
    ref = jax.block_until_ready(reference_forward(x, w_conv, b_conv, w_lin, b_lin))

    assert out.shape == (B,), out.shape
    # f32 end-to-end -> much tighter tolerance than the old bf16 version.
    assert jnp.allclose(out, ref, atol=2e-3, rtol=2e-3), (out, ref)
    print("KERNEL_OK")
</pallas_src>

<mosaic_0001>
module attributes {stable_mosaic.version = 11 : i64} {
  func.func @simple_cnn_kernel(%arg0: i32, %arg1: memref<128x64xf32, #tpu.memory_space<vmem>>, %arg2: memref<64x512xf32, #tpu.memory_space<vmem>>, %arg3: memref<1x512xf32, #tpu.memory_space<vmem>>, %arg4: memref<1x512xf32, #tpu.memory_space<vmem>>, %arg5: memref<1x1xf32, #tpu.memory_space<vmem>>, %arg6: memref<1x128xf32, #tpu.memory_space<vmem>>) attributes {dimension_semantics = [#tpu.dimension_semantics<parallel>], iteration_bounds = array<i64: 1>, scalar_prefetch = 0 : i64, scratch_operands = 0 : i64, tpu.core_type = #tpu.core_type<tc>, window_params = [{transform_indices = @transform_0, window_bounds = array<i64: 128, 64>}, {pipeline_mode = #tpu.pipeline_mode<synchronous>, transform_indices = @transform_1, window_bounds = array<i64: 64, 512>}, {pipeline_mode = #tpu.pipeline_mode<synchronous>, transform_indices = @transform_2, window_bounds = array<i64: 1, 512>}, {pipeline_mode = #tpu.pipeline_mode<synchronous>, transform_indices = @transform_3, window_bounds = array<i64: 1, 512>}, {pipeline_mode = #tpu.pipeline_mode<synchronous>, transform_indices = @transform_4, window_bounds = array<i64: 1, 1>}, {transform_indices = @transform_5, window_bounds = array<i64: 1, 128>}]} {
    %c0 = arith.constant 0 : index
    %c0_0 = arith.constant 0 : index
    %0 = vector.load %arg1[%c0, %c0_0] : memref<128x64xf32, #tpu.memory_space<vmem>>, vector<128x64xf32>
    %c0_1 = arith.constant 0 : index
    %c0_2 = arith.constant 0 : index
    %1 = vector.load %arg2[%c0_1, %c0_2] : memref<64x512xf32, #tpu.memory_space<vmem>>, vector<64x512xf32>
    %cst = arith.constant dense<0.000000e+00> : vector<128x512xf32>
    %2 = tpu.matmul %0, %1, %cst {dimension_numbers = #tpu.dot_dimension_numbers<[1], [0], [0], [1], [0, 0, 1, 1], [], []>} : vector<128x64xf32>, vector<64x512xf32>, vector<128x512xf32> -> vector<128x512xf32>
    %c0_3 = arith.constant 0 : index
    %c0_4 = arith.constant 0 : index
    %3 = vector.load %arg3[%c0_3, %c0_4] : memref<1x512xf32, #tpu.memory_space<vmem>>, vector<1x512xf32>
    %4 = vector.broadcast %3 : vector<1x512xf32> to vector<128x512xf32>
    %5 = arith.addf %2, %4 : vector<128x512xf32>
    %cst_5 = arith.constant 0.000000e+00 : f32
    %6 = vector.broadcast %cst_5 : f32 to vector<128x512xf32>
    %7 = arith.maximumf %5, %6 : vector<128x512xf32>
    %c0_6 = arith.constant 0 : index
    %c0_7 = arith.constant 0 : index
    %8 = vector.load %arg4[%c0_6, %c0_7] : memref<1x512xf32, #tpu.memory_space<vmem>>, vector<1x512xf32>
    %9 = vector.broadcast %8 : vector<1x512xf32> to vector<128x512xf32>
    %10 = arith.mulf %7, %9 : vector<128x512xf32>
    %cst_8 = arith.constant dense<0.000000e+00> : vector<128xf32>
    %11 = vector.multi_reduction <add>, %10, %cst_8 [1] : vector<128x512xf32> to vector<128xf32>
    %12 = vector.shape_cast %11 : vector<128xf32> to vector<1x128xf32>
    %c0_9 = arith.constant 0 : index
    %c0_10 = arith.constant 0 : index
    %13 = vector.load %arg5[%c0_9, %c0_10] : memref<1x1xf32, #tpu.memory_space<vmem>>, vector<1x1xf32>
    %14 = vector.broadcast %13 : vector<1x1xf32> to vector<1x128xf32>
    %15 = arith.addf %12, %14 : vector<1x128xf32>
    %c0_11 = arith.constant 0 : index
    %c0_12 = arith.constant 0 : index
    %16 = vector.load %arg6[%c0_11, %c0_12] : memref<1x128xf32, #tpu.memory_space<vmem>>, vector<1x128xf32>
    tpu.vector_store %arg6[%c0_11, %c0_12], %15 {strides = array<i32>} : memref<1x128xf32, #tpu.memory_space<vmem>>, vector<1x128xf32>,
    return
  }
  func.func @transform_0(%arg0: i32) -> (i32, i32) {
    %c0_i32 = arith.constant 0 : i32
    %c0_i32_0 = arith.constant 0 : i32
    return %arg0, %c0_i32 : i32, i32
  }
  func.func @transform_1(%arg0: i32) -> (i32, i32) {
    %c0_i32 = arith.constant 0 : i32
    %c0_i32_0 = arith.constant 0 : i32
    %c0_i32_1 = arith.constant 0 : i32
    return %c0_i32, %c0_i32_0 : i32, i32
  }
  func.func @transform_2(%arg0: i32) -> (i32, i32) {
    %c0_i32 = arith.constant 0 : i32
    %c0_i32_0 = arith.constant 0 : i32
    %c0_i32_1 = arith.constant 0 : i32
    return %c0_i32, %c0_i32_0 : i32, i32
  }
  func.func @transform_3(%arg0: i32) -> (i32, i32) {
    %c0_i32 = arith.constant 0 : i32
    %c0_i32_0 = arith.constant 0 : i32
    %c0_i32_1 = arith.constant 0 : i32
    return %c0_i32, %c0_i32_0 : i32, i32
  }
  func.func @transform_4(%arg0: i32) -> (i32, i32) {
    %c0_i32 = arith.constant 0 : i32
    %c0_i32_0 = arith.constant 0 : i32
    %c0_i32_1 = arith.constant 0 : i32
    return %c0_i32, %c0_i32_0 : i32, i32
  }
  func.func @transform_5(%arg0: i32) -> (i32, i32) {
    %c0_i32 = arith.constant 0 : i32
    %c0_i32_0 = arith.constant 0 : i32
    return %c0_i32, %arg0 : i32, i32
  }
}

</mosaic_0001>

<bundles_post_ra>
// kernel: simple_cnn_forward.1
= control target key start
LH: loop header
LB: loop body
LE: loop exit
PB: predicated region body
PF: predicated region fallthrough
CT: control target
= control target key end

     0   :  { %vm80_vm0 = vcmask 523264   ;;  %v781_v42 = vmov 0   ;;  %vm651_vm1 = vcmask 130112   ;;  %vm655_vm2 = vcmask 195712   ;;  %s1219_s1 = inlined_call_operand.vmem [shape: f32[64,512], index: 1, kind: input, shape index: {}]   ;;  %s1220_s0 = inlined_call_operand.vmem [shape: f32[128,64], index: 0, kind: input, shape index: {}]   ;;  %s1221_s4 = inlined_call_operand.<no memory space> [shape: f32[1,1], index: 4, kind: input, shape index: {}]   ;;  %s1222_s2 = inlined_call_operand.vmem [shape: f32[1,512], index: 2, kind: input, shape index: {}]   ;;  %s1223_s3 = inlined_call_operand.vmem [shape: f32[1,512], index: 3, kind: input, shape index: {}]   ;;  %s1224_s5 = inlined_call_operand.vmem [shape: f32[1,128], index: 5, kind: output, shape index: {}]  }
   0x1   :  { %v68_v0 = vld [vmem:[%s1219_s1 + $0xf0] sm:$0xff]  ;;  %v69_v2 = vld [vmem:[%s1219_s1 + $0xf8] sm:$0xff]  ;;  %v66_v3 = vld [vmem:[%s1219_s1 + $0xe0] sm:$0xff]  ;;  %v10_v40 = vstv %s1221_s4  ;;  %780 = vset.pattern.permute.xlu0 %v781_v42  ;;  %vm659_vm3 = vcmask 261312   ;;  %vm663_vm4 = vcmask 326912   ;;  %vm667_vm5 = vcmask 392512  }
   0x2   :  { %v64_v1 = vld [vmem:[%s1219_s1 + $0xd0] sm:$0xff]  ;;  %267 = vmatpush.msra.mxu2 %v68_v0  ;;  %332 = vmatpush.msra.mxu3 %v69_v2  ;;  %v67_v4 = vld [vmem:[%s1219_s1 + $0xe8] sm:$0xff]  ;;  %v65_v6 = vld [vmem:[%s1219_s1 + $0xd8] sm:$0xff]  ;;  %11 = vst [vmem:[#allocation2] sm:$0x1] %v10_v40  ;;  %vm671_vm6 = vcmask 458112  }
   0x3   :  { %v60_v5 = vld [vmem:[%s1219_s1 + $0xb0] sm:$0xff]  ;;  %137 = vmatpush.msra.mxu0 %v66_v3  ;;  %202 = vmatpush.msra.mxu1 %v67_v4  ;;  %v62_v7 = vld [vmem:[%s1219_s1 + $0xc0] sm:$0xff]  ;;  %v63_v8 = vld [vmem:[%s1219_s1 + $0xc8] sm:$0xff]  ;;  %vm675_vm7 = vcmask 523712   ;;  %vm679_vm8 = vcmask 589312   ;;  %vm683_vm9 = vcmask 654912  }
   0x4   :  { %268 = vmatpush.msra.mxu2 %v64_v1  ;;  %333 = vmatpush.msra.mxu3 %v65_v6  ;;  %v61_v9 = vld [vmem:[%s1219_s1 + $0xb8] sm:$0xff]  ;;  %v58_v10 = vld [vmem:[%s1219_s1 + $0xa0] sm:$0xff]  ;;  %v56_v11 = vld [vmem:[%s1219_s1 + $0x90] sm:$0xff]  ;;  %vm687_vm10 = vcmask 720512   ;;  %vm691_vm11 = vcmask 786112   ;;  %vm695_vm12 = vcmask 851712  }
   0x5   :  { %138 = vmatpush.msra.mxu0 %v62_v7  ;;  %203 = vmatpush.msra.mxu1 %v63_v8  ;;  %v59_v12 = vld [vmem:[%s1219_s1 + $0xa8] sm:$0xff]  ;;  %v57_v13 = vld [vmem:[%s1219_s1 + $0x98] sm:$0xff]  ;;  %v54_v14 = vld [vmem:[%s1219_s1 + $0x80] sm:$0xff]  ;;  %vm699_vm13 = vcmask 917312   ;;  %vm703_vm14 = vcmask 982912   ;;  %vm707_vm15 = vcmask 1048512  }
   0x6   :  { %269 = vmatpush.msra.mxu2 %v60_v5  ;;  %334 = vmatpush.msra.mxu3 %v61_v9  ;;  %v55_v15 = vld [vmem:[%s1219_s1 + $0x88] sm:$0xff]  ;;  %v52_v16 = vld [vmem:[%s1219_s1 + $0x70] sm:$0xff]  ;;  %v53_v17 = vld [vmem:[%s1219_s1 + $0x78] sm:$0xff] }
   0x7   :  { %139 = vmatpush.msra.mxu0 %v58_v10  ;;  %204 = vmatpush.msra.mxu1 %v59_v12  ;;  %v50_v18 = vld [vmem:[%s1219_s1 + $0x60] sm:$0xff]  ;;  %v51_v19 = vld [vmem:[%s1219_s1 + $0x68] sm:$0xff]  ;;  %v48_v20 = vld [vmem:[%s1219_s1 + $0x50] sm:$0xff] }
   0x8   :  { %270 = vmatpush.msra.mxu2 %v56_v11  ;;  %335 = vmatpush.msra.mxu3 %v57_v13  ;;  %v49_v21 = vld [vmem:[%s1219_s1 + $0x58] sm:$0xff]  ;;  %v46_v22 = vld [vmem:[%s1219_s1 + $0x40] sm:$0xff]  ;;  %v47_v23 = vld [vmem:[%s1219_s1 + $0x48] sm:$0xff] }
   0x9   :  { %140 = vmatpush.msra.mxu0 %v54_v14  ;;  %205 = vmatpush.msra.mxu1 %v55_v15  ;;  %v44_v24 = vld [vmem:[%s1219_s1 + $0x30] sm:$0xff]  ;;  %v45_v25 = vld [vmem:[%s1219_s1 + $0x38] sm:$0xff]  ;;  %v42_v26 = vld [vmem:[%s1219_s1 + $0x20] sm:$0xff] }
   0xa   :  { %271 = vmatpush.msra.mxu2 %v52_v16  ;;  %336 = vmatpush.msra.mxu3 %v53_v17  ;;  %v43_v27 = vld [vmem:[%s1219_s1 + $0x28] sm:$0xff]  ;;  %v40_v28 = vld [vmem:[%s1219_s1 + $0x10] sm:$0xff]  ;;  %v41_v29 = vld [vmem:[%s1219_s1 + $0x18] sm:$0xff] }
   0xb   :  { %141 = vmatpush.msra.mxu0 %v50_v18  ;;  %206 = vmatpush.msra.mxu1 %v51_v19  ;;  %v22_v30 = vld [vmem:[%s1220_s0] sm:$0xff]  ;;  %v39_v32 = vld [vmem:[%s1219_s1 + $0x8] sm:$0xff]  ;;  %v24_v34 = vld [vmem:[%s1220_s0 + $0x10] sm:$0xff] }
   0xc   :  { %272 = vmatpush.msra.mxu2 %v48_v20  ;;  %337 = vmatpush.msra.mxu3 %v49_v21  ;;  %v38_v31 = vld [vmem:[%s1219_s1] sm:$0xff]  ;;  %v23_v33 = vld [vmem:[%s1220_s0 + $0x8] sm:$0xff]  ;;  %v25_v35 = vld [vmem:[%s1220_s0 + $0x18] sm:$0xff] }
   0xd   :  { %142 = vmatpush.msra.mxu0 %v46_v22  ;;  %207 = vmatpush.msra.mxu1 %v47_v23  ;;  %v26_v36 = vld [vmem:[%s1220_s0 + $0x20] sm:$0xff]  ;;  %v27_v37 = vld [vmem:[%s1220_s0 + $0x28] sm:$0xff]  ;;  %v28_v38 = vld [vmem:[%s1220_s0 + $0x30] sm:$0xff] }
   0xe   :  { %273 = vmatpush.msra.mxu2 %v44_v24  ;;  %338 = vmatpush.msra.mxu3 %v45_v25  ;;  %v29_v39 = vld [vmem:[%s1220_s0 + $0x38] sm:$0xff]  ;;  %v30_v41 = vld [vmem:[%s1220_s0 + $0x40] sm:$0xff]  ;;  %v31_v44 = vld [vmem:[%s1220_s0 + $0x48] sm:$0xff] }
   0xf   :  { %143 = vmatpush.msra.mxu0 %v42_v26  ;;  %208 = vmatpush.msra.mxu1 %v43_v27  ;;  %v607_v43 = vld [vmem:[#allocation2] sm:$0x1]  ;;  %v32_v45 = vld [vmem:[%s1220_s0 + $0x50] sm:$0xff]  ;;  %v33_v46 = vld [vmem:[%s1220_s0 + $0x58] sm:$0xff] }
  0x10   :  { %274 = vmatpush.msra.mxu2 %v40_v28  ;;  %339 = vmatpush.msra.mxu3 %v41_v29  ;;  %v34_v47 = vld [vmem:[%s1220_s0 + $0x60] sm:$0xff]  ;;  %v35_v48 = vld [vmem:[%s1220_s0 + $0x68] sm:$0xff]  ;;  %v36_v49 = vld [vmem:[%s1220_s0 + $0x70] sm:$0xff] }
  0x11   :  { %747 = vmatmul.msk.f32.vlgmr.msra.gmra.mxu2 %vm80_vm0, %v22_v30  ;;  %763 = vmatmul.msk.f32.vlgmr.msra.gmra.mxu3 %vm80_vm0, %v22_v30  ;;  %v37_v50 = vld [vmem:[%s1220_s0 + $0x78] sm:$0xff]  ;;  %v70_v51 = vld [vmem:[%s1222_s2] sm:$0xf] }
  0x12   :  { %144 = vmatpush.msra.mxu0 %v38_v31  ;;  %209 = vmatpush.msra.mxu1 %v39_v32  ;;  %v1026_v52 = vperm.slane %v70_v51, 0  ;;  %v453_v53 = vld [vmem:[%s1223_s3] sm:$0xf]  ;;  %v1031_v54 = vperm.slane %v70_v51, 1  ;;  %v1035_v58 = vperm.slane %v70_v51, 2  ;;  %v1041_v62 = vperm.slane %v70_v51, 3 }
  0x13   :  { %715 = vmatmul.msk.f32.vlgmr.msra.gmra.mxu0 %vm80_vm0, %v22_v30  ;;  %731 = vmatmul.msk.f32.vlgmr.msra.gmra.mxu1 %vm80_vm0, %v22_v30  ;;  %v1033_v56 = vperm.slane %v453_v53, 0  ;;  %v1039_v61 = vperm.slane %v453_v53, 1  ;;  %v1043_v2 = vperm.slane %v453_v53, 2  ;;  %v1049_v8 = vperm.slane %v453_v53, 3 }
  0x14   :  { %610 = vperm.xlu0 %780, %v607_v43  }
  0x19   :  { %748 = vmatmul.msk.f32.gmra.mxu2 %vm80_vm0, %v23_v33  ;;  %764 = vmatmul.msk.f32.gmra.mxu3 %vm80_vm0, %v23_v33 }
  0x1b   :  { %716 = vmatmul.msk.f32.gmra.mxu0 %vm80_vm0, %v23_v33  ;;  %732 = vmatmul.msk.f32.gmra.mxu1 %vm80_vm0, %v23_v33 }
  0x21   :  { %749 = vmatmul.msk.f32.gmra.mxu2 %vm80_vm0, %v24_v34  ;;  %765 = vmatmul.msk.f32.gmra.mxu3 %vm80_vm0, %v24_v34 }
  0x23   :  { %717 = vmatmul.msk.f32.gmra.mxu0 %vm80_vm0, %v24_v34  ;;  %733 = vmatmul.msk.f32.gmra.mxu1 %vm80_vm0, %v24_v34 }
  0x29   :  { %750 = vmatmul.msk.f32.gmra.mxu2 %vm80_vm0, %v25_v35  ;;  %766 = vmatmul.msk.f32.gmra.mxu3 %vm80_vm0, %v25_v35 }
  0x2b   :  { %718 = vmatmul.msk.f32.gmra.mxu0 %vm80_vm0, %v25_v35  ;;  %734 = vmatmul.msk.f32.gmra.mxu1 %vm80_vm0, %v25_v35 }
  0x31   :  { %751 = vmatmul.msk.f32.gmra.mxu2 %vm80_vm0, %v26_v36  ;;  %767 = vmatmul.msk.f32.gmra.mxu3 %vm80_vm0, %v26_v36 }
  0x33   :  { %719 = vmatmul.msk.f32.gmra.mxu0 %vm80_vm0, %v26_v36  ;;  %735 = vmatmul.msk.f32.gmra.mxu1 %vm80_vm0, %v26_v36 }
  0x39   :  { %752 = vmatmul.msk.f32.gmra.mxu2 %vm80_vm0, %v27_v37  ;;  %768 = vmatmul.msk.f32.gmra.mxu3 %vm80_vm0, %v27_v37 }
  0x3b   :  { %720 = vmatmul.msk.f32.gmra.mxu0 %vm80_vm0, %v27_v37  ;;  %736 = vmatmul.msk.f32.gmra.mxu1 %vm80_vm0, %v27_v37 }
  0x41   :  { %753 = vmatmul.msk.f32.gmra.mxu2 %vm80_vm0, %v28_v38  ;;  %769 = vmatmul.msk.f32.gmra.mxu3 %vm80_vm0, %v28_v38 }
  0x43   :  { %721 = vmatmul.msk.f32.gmra.mxu0 %vm80_vm0, %v28_v38  ;;  %737 = vmatmul.msk.f32.gmra.mxu1 %vm80_vm0, %v28_v38 }
  0x49   :  { %754 = vmatmul.msk.f32.gmra.mxu2 %vm80_vm0, %v29_v39  ;;  %770 = vmatmul.msk.f32.gmra.mxu3 %vm80_vm0, %v29_v39 }
  0x4b   :  { %722 = vmatmul.msk.f32.gmra.mxu0 %vm80_vm0, %v29_v39  ;;  %738 = vmatmul.msk.f32.gmra.mxu1 %vm80_vm0, %v29_v39 }
  0x51   :  { %755 = vmatmul.msk.f32.gmra.mxu2 %vm80_vm0, %v30_v41  ;;  %771 = vmatmul.msk.f32.gmra.mxu3 %vm80_vm0, %v30_v41 }
  0x53   :  { %723 = vmatmul.msk.f32.gmra.mxu0 %vm80_vm0, %v30_v41  ;;  %739 = vmatmul.msk.f32.gmra.mxu1 %vm80_vm0, %v30_v41 }
  0x59   :  { %756 = vmatmul.msk.f32.gmra.mxu2 %vm80_vm0, %v31_v44  ;;  %772 = vmatmul.msk.f32.gmra.mxu3 %vm80_vm0, %v31_v44 }
  0x5b   :  { %724 = vmatmul.msk.f32.gmra.mxu0 %vm80_vm0, %v31_v44  ;;  %740 = vmatmul.msk.f32.gmra.mxu1 %vm80_vm0, %v31_v44 }
  0x61   :  { %757 = vmatmul.msk.f32.gmra.mxu2 %vm80_vm0, %v32_v45  ;;  %773 = vmatmul.msk.f32.gmra.mxu3 %vm80_vm0, %v32_v45 }
  0x63   :  { %725 = vmatmul.msk.f32.gmra.mxu0 %vm80_vm0, %v32_v45  ;;  %741 = vmatmul.msk.f32.gmra.mxu1 %vm80_vm0, %v32_v45 }
  0x69   :  { %758 = vmatmul.msk.f32.gmra.mxu2 %vm80_vm0, %v33_v46  ;;  %774 = vmatmul.msk.f32.gmra.mxu3 %vm80_vm0, %v33_v46 }
  0x6b   :  { %726 = vmatmul.msk.f32.gmra.mxu0 %vm80_vm0, %v33_v46  ;;  %742 = vmatmul.msk.f32.gmra.mxu1 %vm80_vm0, %v33_v46 }
  0x71   :  { %759 = vmatmul.msk.f32.gmra.mxu2 %vm80_vm0, %v34_v47  ;;  %775 = vmatmul.msk.f32.gmra.mxu3 %vm80_vm0, %v34_v47 }
  0x73   :  { %727 = vmatmul.msk.f32.gmra.mxu0 %vm80_vm0, %v34_v47  ;;  %743 = vmatmul.msk.f32.gmra.mxu1 %vm80_vm0, %v34_v47 }
  0x79   :  { %760 = vmatmul.msk.f32.gmra.mxu2 %vm80_vm0, %v35_v48  ;;  %776 = vmatmul.msk.f32.gmra.mxu3 %vm80_vm0, %v35_v48 }
  0x7b   :  { %728 = vmatmul.msk.f32.gmra.mxu0 %vm80_vm0, %v35_v48  ;;  %744 = vmatmul.msk.f32.gmra.mxu1 %vm80_vm0, %v35_v48 }
  0x81   :  { %761 = vmatmul.msk.f32.gmra.mxu2 %vm80_vm0, %v36_v49  ;;  %777 = vmatmul.msk.f32.gmra.mxu3 %vm80_vm0, %v36_v49 }
  0x83   :  { %729 = vmatmul.msk.f32.gmra.mxu0 %vm80_vm0, %v36_v49  ;;  %745 = vmatmul.msk.f32.gmra.mxu1 %vm80_vm0, %v36_v49 }
  0x89   :  { %762 = vmatmul.msk.f32.gmra.mxu2 %vm80_vm0, %v37_v50  ;;  %778 = vmatmul.msk.f32.gmra.mxu3 %vm80_vm0, %v37_v50 }
  0x8b   :  { %730 = vmatmul.msk.f32.gmra.mxu0 %vm80_vm0, %v37_v50  ;;  %746 = vmatmul.msk.f32.gmra.mxu1 %vm80_vm0, %v37_v50 }
  0x90   :  { %v146_v55 = vpop.f32.mrf.mxu0  ;;  %v211_v57 = vpop.f32.mrf.mxu1 }
  0x91   :  { %v147_v59 = vadd.f32 %v146_v55, %v1026_v52  ;;  %v212_v60 = vadd.f32 %v211_v57, %v1031_v54 }
  0x93   :  { %v389_v63 = vmax.f32 %v147_v59, 0.0  ;;  %v390_v0 = vmax.f32 %v212_v60, 0.0 }
  0x94   :  { %v276_v1 = vpop.f32.mrf.mxu2  ;;  %v341_v3 = vpop.f32.mrf.mxu3 }
  0x95   :  { %v463_v4 = vmul.f32 %v1033_v56, %v389_v63  ;;  %v464_v5 = vmul.f32 %v1039_v61, %v390_v0  ;;  %v277_v6 = vadd.f32 %v276_v1, %v1035_v58  ;;  %v342_v7 = vadd.f32 %v341_v3, %v1041_v62 }
  0x97   :  { %v527_v9 = vadd.f32 %v464_v5, %v463_v4  ;;  %v391_v10 = vmax.f32 %v277_v6, 0.0  ;;  %v392_v11 = vmax.f32 %v342_v7, 0.0 }
  0x98   :  { %v149_v12 = vpop.f32.mrf.mxu0  ;;  %v214_v13 = vpop.f32.mrf.mxu1 }
  0x99   :  { %v465_v14 = vmul.f32 %v1043_v2, %v391_v10  ;;  %v150_v15 = vadd.f32 %v149_v12, %v1026_v52  ;;  %v215_v16 = vadd.f32 %v214_v13, %v1031_v54  ;;  %v466_v17 = vmul.f32 %v1049_v8, %v392_v11 }
  0x9b   :  { %v393_v18 = vmax.f32 %v150_v15, 0.0  ;;  %v394_v19 = vmax.f32 %v215_v16, 0.0  ;;  %v528_v20 = vadd.f32 %v527_v9, %v465_v14 }
  0x9c   :  { %v279_v21 = vpop.f32.mrf.mxu2  ;;  %v344_v22 = vpop.f32.mrf.mxu3 }
  0x9d   :  { %v467_v23 = vmul.f32 %v1033_v56, %v393_v18  ;;  %v468_v24 = vmul.f32 %v1039_v61, %v394_v19  ;;  %v280_v25 = vadd.f32 %v279_v21, %v1035_v58  ;;  %v345_v26 = vadd.f32 %v344_v22, %v1041_v62 }
  0x9e   :  { %v529_v27 = vadd.f32 %v528_v20, %v466_v17 }
  0x9f   :  { %v395_v28 = vmax.f32 %v280_v25, 0.0  ;;  %v396_v29 = vmax.f32 %v345_v26, 0.0  ;;  %v532_v30 = vadd.f32 %v468_v24, %v467_v23 }
  0xa0   :  { %530 = vadd.xlane.f32.xlu0 %v529_v27  ;;  %v152_v31 = vpop.f32.mrf.mxu0  ;;  %v217_v32 = vpop.f32.mrf.mxu1 }
  0xa1   :  { %v469_v33 = vmul.f32 %v1043_v2, %v395_v28  ;;  %v153_v34 = vadd.f32 %v152_v31, %v1026_v52  ;;  %v218_v35 = vadd.f32 %v217_v32, %v1031_v54  ;;  %v470_v36 = vmul.f32 %v1049_v8, %v396_v29 }
  0xa3   :  { %v397_v37 = vmax.f32 %v153_v34, 0.0  ;;  %v398_v38 = vmax.f32 %v218_v35, 0.0  ;;  %v533_v39 = vadd.f32 %v532_v30, %v469_v33 }
  0xa4   :  { %v282_v40 = vpop.f32.mrf.mxu2  ;;  %v347_v41 = vpop.f32.mrf.mxu3 }
  0xa5   :  { %v471_v42 = vmul.f32 %v1033_v56, %v397_v37  ;;  %v472_v43 = vmul.f32 %v1039_v61, %v398_v38  ;;  %v283_v44 = vadd.f32 %v282_v40, %v1035_v58  ;;  %v348_v45 = vadd.f32 %v347_v41, %v1041_v62 }
  0xa6   :  { %v534_v46 = vadd.f32 %v533_v39, %v470_v36 }
  0xa7   :  { %v537_v47 = vadd.f32 %v472_v43, %v471_v42  ;;  %v399_v48 = vmax.f32 %v283_v44, 0.0  ;;  %v400_v49 = vmax.f32 %v348_v45, 0.0 }
  0xa8   :  { %535 = vadd.xlane.f32.xlu1 %v534_v46  ;;  %v155_v50 = vpop.f32.mrf.mxu0  ;;  %v220_v51 = vpop.f32.mrf.mxu1 }
  0xa9   :  { %v473_v53 = vmul.f32 %v1043_v2, %v399_v48  ;;  %v156_v55 = vadd.f32 %v155_v50, %v1026_v52  ;;  %v221_v57 = vadd.f32 %v220_v51, %v1031_v54  ;;  %v474_v59 = vmul.f32 %v1049_v8, %v400_v49 }
  0xab   :  { %v401_v60 = vmax.f32 %v156_v55, 0.0  ;;  %v402_v63 = vmax.f32 %v221_v57, 0.0  ;;  %v538_v0 = vadd.f32 %v537_v47, %v473_v53 }
  0xac   :  { %v285_v1 = vpop.f32.mrf.mxu2  ;;  %v350_v3 = vpop.f32.mrf.mxu3 }
  0xad   :  { %v475_v4 = vmul.f32 %v1033_v56, %v401_v60  ;;  %v476_v5 = vmul.f32 %v1039_v61, %v402_v63  ;;  %v286_v6 = vadd.f32 %v285_v1, %v1035_v58  ;;  %v351_v7 = vadd.f32 %v350_v3, %v1041_v62 }
  0xae   :  { %v539_v9 = vadd.f32 %v538_v0, %v474_v59 }
  0xaf   :  { %v403_v10 = vmax.f32 %v286_v6, 0.0  ;;  %v404_v11 = vmax.f32 %v351_v7, 0.0  ;;  %v542_v12 = vadd.f32 %v476_v5, %v475_v4 }
  0xb0   :  { %540 = vadd.xlane.f32.xlu1 %v539_v9  ;;  %v158_v13 = vpop.f32.mrf.mxu0  ;;  %v223_v14 = vpop.f32.mrf.mxu1 }
  0xb1   :  { %v477_v15 = vmul.f32 %v1043_v2, %v403_v10  ;;  %v159_v16 = vadd.f32 %v158_v13, %v1026_v52  ;;  %v224_v17 = vadd.f32 %v223_v14, %v1031_v54  ;;  %v478_v18 = vmul.f32 %v1049_v8, %v404_v11 }
  0xb3   :  { %v405_v19 = vmax.f32 %v159_v16, 0.0  ;;  %v406_v20 = vmax.f32 %v224_v17, 0.0  ;;  %v543_v21 = vadd.f32 %v542_v12, %v477_v15 }
  0xb4   :  { %v288_v22 = vpop.f32.mrf.mxu2  ;;  %v353_v23 = vpop.f32.mrf.mxu3 }
  0xb5   :  { %v479_v24 = vmul.f32 %v1033_v56, %v405_v19  ;;  %v480_v25 = vmul.f32 %v1039_v61, %v406_v20  ;;  %v289_v26 = vadd.f32 %v288_v22, %v1035_v58  ;;  %v354_v27 = vadd.f32 %v353_v23, %v1041_v62 }
  0xb6   :  { %v544_v28 = vadd.f32 %v543_v21, %v478_v18 }
  0xb7   :  { %v547_v29 = vadd.f32 %v480_v25, %v479_v24  ;;  %v407_v30 = vmax.f32 %v289_v26, 0.0  ;;  %v408_v31 = vmax.f32 %v354_v27, 0.0 }
  0xb8   :  { %545 = vadd.xlane.f32.xlu2 %v544_v28  ;;  %v161_v32 = vpop.f32.mrf.mxu0  ;;  %v226_v33 = vpop.f32.mrf.mxu1 }
  0xb9   :  { %v481_v34 = vmul.f32 %v1043_v2, %v407_v30  ;;  %v162_v35 = vadd.f32 %v161_v32, %v1026_v52  ;;  %v227_v36 = vadd.f32 %v226_v33, %v1031_v54  ;;  %v482_v37 = vmul.f32 %v1049_v8, %v408_v31 }
  0xbb   :  { %v409_v38 = vmax.f32 %v162_v35, 0.0  ;;  %v410_v39 = vmax.f32 %v227_v36, 0.0  ;;  %v548_v40 = vadd.f32 %v547_v29, %v481_v34 }
  0xbc   :  { %v291_v41 = vpop.f32.mrf.mxu2  ;;  %v356_v42 = vpop.f32.mrf.mxu3 }
  0xbd   :  { %v483_v43 = vmul.f32 %v1033_v56, %v409_v38  ;;  %v484_v44 = vmul.f32 %v1039_v61, %v410_v39  ;;  %v292_v45 = vadd.f32 %v291_v41, %v1035_v58  ;;  %v357_v46 = vadd.f32 %v356_v42, %v1041_v62 }
  0xbe   :  { %v549_v47 = vadd.f32 %v548_v40, %v482_v37 }
  0xbf   :  { %v552_v48 = vadd.f32 %v484_v44, %v483_v43  ;;  %v411_v49 = vmax.f32 %v292_v45, 0.0  ;;  %v412_v50 = vmax.f32 %v357_v46, 0.0 }
  0xc0   :  { %550 = vadd.xlane.f32.xlu2 %v549_v47  ;;  %v164_v51 = vpop.f32.mrf.mxu0  ;;  %v229_v53 = vpop.f32.mrf.mxu1 }
  0xc1   :  { %v485_v55 = vmul.f32 %v1043_v2, %v411_v49  ;;  %v165_v57 = vadd.f32 %v164_v51, %v1026_v52  ;;  %v230_v59 = vadd.f32 %v229_v53, %v1031_v54  ;;  %v486_v60 = vmul.f32 %v1049_v8, %v412_v50 }
  0xc3   :  { %v413_v63 = vmax.f32 %v165_v57, 0.0  ;;  %v414_v0 = vmax.f32 %v230_v59, 0.0  ;;  %v553_v1 = vadd.f32 %v552_v48, %v485_v55 }
  0xc4   :  { %v294_v3 = vpop.f32.mrf.mxu2  ;;  %v359_v4 = vpop.f32.mrf.mxu3 }
  0xc5   :  { %v487_v5 = vmul.f32 %v1033_v56, %v413_v63  ;;  %v488_v6 = vmul.f32 %v1039_v61, %v414_v0  ;;  %v295_v7 = vadd.f32 %v294_v3, %v1035_v58  ;;  %v360_v9 = vadd.f32 %v359_v4, %v1041_v62 }
  0xc6   :  { %v554_v10 = vadd.f32 %v553_v1, %v486_v60 }
  0xc7   :  { %v557_v11 = vadd.f32 %v488_v6, %v487_v5  ;;  %v415_v12 = vmax.f32 %v295_v7, 0.0  ;;  %v416_v13 = vmax.f32 %v360_v9, 0.0 }
  0xc8   :  { %555 = vadd.xlane.f32.xlu1 %v554_v10  ;;  %v167_v14 = vpop.f32.mrf.mxu0  ;;  %v232_v15 = vpop.f32.mrf.mxu1 }
  0xc9   :  { %v489_v16 = vmul.f32 %v1043_v2, %v415_v12  ;;  %v168_v17 = vadd.f32 %v167_v14, %v1026_v52  ;;  %v233_v18 = vadd.f32 %v232_v15, %v1031_v54  ;;  %v490_v19 = vmul.f32 %v1049_v8, %v416_v13 }
  0xcb   :  { %v417_v20 = vmax.f32 %v168_v17, 0.0  ;;  %v418_v21 = vmax.f32 %v233_v18, 0.0  ;;  %v558_v22 = vadd.f32 %v557_v11, %v489_v16 }
  0xcc   :  { %v297_v23 = vpop.f32.mrf.mxu2  ;;  %v362_v24 = vpop.f32.mrf.mxu3 }
  0xcd   :  { %v491_v25 = vmul.f32 %v1033_v56, %v417_v20  ;;  %v492_v26 = vmul.f32 %v1039_v61, %v418_v21  ;;  %v298_v27 = vadd.f32 %v297_v23, %v1035_v58  ;;  %v363_v28 = vadd.f32 %v362_v24, %v1041_v62 }
  0xce   :  { %v559_v29 = vadd.f32 %v558_v22, %v490_v19 }
  0xcf   :  { %v562_v30 = vadd.f32 %v492_v26, %v491_v25  ;;  %v419_v31 = vmax.f32 %v298_v27, 0.0  ;;  %v420_v32 = vmax.f32 %v363_v28, 0.0 }
  0xd0   :  { %560 = vadd.xlane.f32.xlu2 %v559_v29  ;;  %v170_v33 = vpop.f32.mrf.mxu0  ;;  %v235_v34 = vpop.f32.mrf.mxu1 }
  0xd1   :  { %v493_v35 = vmul.f32 %v1043_v2, %v419_v31  ;;  %v171_v36 = vadd.f32 %v170_v33, %v1026_v52  ;;  %v236_v37 = vadd.f32 %v235_v34, %v1031_v54  ;;  %v494_v38 = vmul.f32 %v1049_v8, %v420_v32 }
  0xd3   :  { %v421_v39 = vmax.f32 %v171_v36, 0.0  ;;  %v422_v40 = vmax.f32 %v236_v37, 0.0  ;;  %v563_v41 = vadd.f32 %v562_v30, %v493_v35 }
  0xd4   :  { %v300_v42 = vpop.f32.mrf.mxu2  ;;  %v365_v43 = vpop.f32.mrf.mxu3 }
  0xd5   :  { %v495_v44 = vmul.f32 %v1033_v56, %v421_v39  ;;  %v496_v45 = vmul.f32 %v1039_v61, %v422_v40  ;;  %v301_v46 = vadd.f32 %v300_v42, %v1035_v58  ;;  %v366_v47 = vadd.f32 %v365_v43, %v1041_v62 }
  0xd6   :  { %v564_v48 = vadd.f32 %v563_v41, %v494_v38 }
  0xd7   :  { %v567_v49 = vadd.f32 %v496_v45, %v495_v44  ;;  %v423_v50 = vmax.f32 %v301_v46, 0.0  ;;  %v424_v51 = vmax.f32 %v366_v47, 0.0 }
  0xd8   :  { %565 = vadd.xlane.f32.xlu1 %v564_v48  ;;  %v173_v53 = vpop.f32.mrf.mxu0  ;;  %v238_v55 = vpop.f32.mrf.mxu1 }
  0xd9   :  { %v497_v57 = vmul.f32 %v1043_v2, %v423_v50  ;;  %v174_v59 = vadd.f32 %v173_v53, %v1026_v52  ;;  %v239_v60 = vadd.f32 %v238_v55, %v1031_v54  ;;  %v498_v63 = vmul.f32 %v1049_v8, %v424_v51 }
  0xdb   :  { %v425_v0 = vmax.f32 %v174_v59, 0.0  ;;  %v426_v1 = vmax.f32 %v239_v60, 0.0  ;;  %v568_v3 = vadd.f32 %v567_v49, %v497_v57 }
  0xdc   :  { %v303_v4 = vpop.f32.mrf.mxu2  ;;  %v368_v5 = vpop.f32.mrf.mxu3 }
  0xdd   :  { %v499_v6 = vmul.f32 %v1033_v56, %v425_v0  ;;  %v500_v7 = vmul.f32 %v1039_v61, %v426_v1  ;;  %v304_v9 = vadd.f32 %v303_v4, %v1035_v58  ;;  %v369_v10 = vadd.f32 %v368_v5, %v1041_v62 }
  0xde   :  { %v569_v11 = vadd.f32 %v568_v3, %v498_v63 }
  0xdf   :  { %v572_v12 = vadd.f32 %v500_v7, %v499_v6  ;;  %v427_v13 = vmax.f32 %v304_v9, 0.0  ;;  %v428_v14 = vmax.f32 %v369_v10, 0.0 }
  0xe0   :  { %570 = vadd.xlane.f32.xlu2 %v569_v11  ;;  %v176_v15 = vpop.f32.mrf.mxu0  ;;  %v241_v16 = vpop.f32.mrf.mxu1 }
  0xe1   :  { %v501_v17 = vmul.f32 %v1043_v2, %v427_v13  ;;  %v177_v18 = vadd.f32 %v176_v15, %v1026_v52  ;;  %v242_v19 = vadd.f32 %v241_v16, %v1031_v54  ;;  %v502_v20 = vmul.f32 %v1049_v8, %v428_v14 }
  0xe3   :  { %v429_v21 = vmax.f32 %v177_v18, 0.0  ;;  %v430_v22 = vmax.f32 %v242_v19, 0.0  ;;  %v573_v23 = vadd.f32 %v572_v12, %v501_v17 }
  0xe4   :  { %v306_v24 = vpop.f32.mrf.mxu2  ;;  %v371_v25 = vpop.f32.mrf.mxu3 }
  0xe5   :  { %v503_v26 = vmul.f32 %v1033_v56, %v429_v21  ;;  %v504_v27 = vmul.f32 %v1039_v61, %v430_v22  ;;  %v307_v28 = vadd.f32 %v306_v24, %v1035_v58  ;;  %v372_v29 = vadd.f32 %v371_v25, %v1041_v62 }
  0xe6   :  { %v574_v30 = vadd.f32 %v573_v23, %v502_v20 }
  0xe7   :  { %v577_v31 = vadd.f32 %v504_v27, %v503_v26  ;;  %v431_v32 = vmax.f32 %v307_v28, 0.0  ;;  %v432_v33 = vmax.f32 %v372_v29, 0.0 }
  0xe8   :  { %575 = vadd.xlane.f32.xlu1 %v574_v30  ;;  %v179_v34 = vpop.f32.mrf.mxu0  ;;  %v244_v35 = vpop.f32.mrf.mxu1 }
  0xe9   :  { %v505_v36 = vmul.f32 %v1043_v2, %v431_v32  ;;  %v180_v37 = vadd.f32 %v179_v34, %v1026_v52  ;;  %v245_v38 = vadd.f32 %v244_v35, %v1031_v54  ;;  %v506_v39 = vmul.f32 %v1049_v8, %v432_v33 }
  0xeb   :  { %v433_v40 = vmax.f32 %v180_v37, 0.0  ;;  %v434_v41 = vmax.f32 %v245_v38, 0.0  ;;  %v578_v42 = vadd.f32 %v577_v31, %v505_v36 }
  0xec   :  { %v309_v43 = vpop.f32.mrf.mxu2  ;;  %v374_v44 = vpop.f32.mrf.mxu3 }
  0xed   :  { %v507_v45 = vmul.f32 %v1033_v56, %v433_v40  ;;  %v508_v46 = vmul.f32 %v1039_v61, %v434_v41  ;;  %v310_v47 = vadd.f32 %v309_v43, %v1035_v58  ;;  %v375_v48 = vadd.f32 %v374_v44, %v1041_v62 }
  0xee   :  { %v579_v49 = vadd.f32 %v578_v42, %v506_v39 }
  0xef   :  { %v582_v50 = vadd.f32 %v508_v46, %v507_v45  ;;  %v435_v51 = vmax.f32 %v310_v47, 0.0  ;;  %v436_v53 = vmax.f32 %v375_v48, 0.0 }
  0xf0   :  { %580 = vadd.xlane.f32.xlu2 %v579_v49  ;;  %v182_v55 = vpop.f32.mrf.mxu0  ;;  %v247_v57 = vpop.f32.mrf.mxu1 }
  0xf1   :  { %v509_v59 = vmul.f32 %v1043_v2, %v435_v51  ;;  %v183_v60 = vadd.f32 %v182_v55, %v1026_v52  ;;  %v248_v63 = vadd.f32 %v247_v57, %v1031_v54  ;;  %v510_v0 = vmul.f32 %v1049_v8, %v436_v53 }
  0xf3   :  { %v437_v1 = vmax.f32 %v183_v60, 0.0  ;;  %v438_v3 = vmax.f32 %v248_v63, 0.0  ;;  %v583_v4 = vadd.f32 %v582_v50, %v509_v59 }
  0xf4   :  { %v312_v5 = vpop.f32.mrf.mxu2  ;;  %v377_v6 = vpop.f32.mrf.mxu3 }
  0xf5   :  { %v511_v7 = vmul.f32 %v1033_v56, %v437_v1  ;;  %v512_v9 = vmul.f32 %v1039_v61, %v438_v3  ;;  %v313_v10 = vadd.f32 %v312_v5, %v1035_v58  ;;  %v378_v11 = vadd.f32 %v377_v6, %v1041_v62 }
  0xf6   :  { %v584_v12 = vadd.f32 %v583_v4, %v510_v0 }
  0xf7   :  { %v587_v13 = vadd.f32 %v512_v9, %v511_v7  ;;  %v439_v14 = vmax.f32 %v313_v10, 0.0  ;;  %v440_v15 = vmax.f32 %v378_v11, 0.0 }
  0xf8   :  { %585 = vadd.xlane.f32.xlu1 %v584_v12  ;;  %v185_v16 = vpop.f32.mrf.mxu0  ;;  %v250_v17 = vpop.f32.mrf.mxu1 }
  0xf9   :  { %v513_v18 = vmul.f32 %v1043_v2, %v439_v14  ;;  %v186_v19 = vadd.f32 %v185_v16, %v1026_v52  ;;  %v251_v20 = vadd.f32 %v250_v17, %v1031_v54  ;;  %v514_v21 = vmul.f32 %v1049_v8, %v440_v15 }
  0xfb   :  { %v441_v22 = vmax.f32 %v186_v19, 0.0  ;;  %v442_v23 = vmax.f32 %v251_v20, 0.0  ;;  %v588_v24 = vadd.f32 %v587_v13, %v513_v18 }
  0xfc   :  { %v315_v25 = vpop.f32.mrf.mxu2  ;;  %v380_v26 = vpop.f32.mrf.mxu3 }
  0xfd   :  { %v515_v27 = vmul.f32 %v1033_v56, %v441_v22  ;;  %v516_v28 = vmul.f32 %v1039_v61, %v442_v23  ;;  %v316_v29 = vadd.f32 %v315_v25, %v1035_v58  ;;  %v381_v30 = vadd.f32 %v380_v26, %v1041_v62 }
  0xfe   :  { %v589_v31 = vadd.f32 %v588_v24, %v514_v21  ;;  %v646_v24 = vlaneseq }
  0xff   :  { %v592_v32 = vadd.f32 %v516_v28, %v515_v27  ;;  %v443_v33 = vmax.f32 %v316_v29, 0.0  ;;  %v444_v34 = vmax.f32 %v381_v30, 0.0 }
 0x100   :  { %590 = vadd.xlane.f32.xlu2 %v589_v31  ;;  %v188_v35 = vpop.f32.mrf.mxu0  ;;  %v253_v36 = vpop.f32.mrf.mxu1 }
 0x101   :  { %v517_v37 = vmul.f32 %v1043_v2, %v443_v33  ;;  %v189_v38 = vadd.f32 %v188_v35, %v1026_v52  ;;  %v254_v39 = vadd.f32 %v253_v36, %v1031_v54  ;;  %v518_v40 = vmul.f32 %v1049_v8, %v444_v34 }
 0x103   :  { %v445_v41 = vmax.f32 %v189_v38, 0.0  ;;  %v446_v42 = vmax.f32 %v254_v39, 0.0  ;;  %v593_v43 = vadd.f32 %v592_v32, %v517_v37 }
 0x104   :  { %v318_v44 = vpop.f32.mrf.mxu2  ;;  %v383_v45 = vpop.f32.mrf.mxu3 }
 0x105   :  { %v519_v46 = vmul.f32 %v1033_v56, %v445_v41  ;;  %v520_v47 = vmul.f32 %v1039_v61, %v446_v42  ;;  %v319_v48 = vadd.f32 %v318_v44, %v1035_v58  ;;  %v384_v49 = vadd.f32 %v383_v45, %v1041_v62 }
 0x106   :  { %v594_v50 = vadd.f32 %v593_v43, %v518_v40 }
 0x107   :  { %v597_v51 = vadd.f32 %v520_v47, %v519_v46  ;;  %v447_v53 = vmax.f32 %v319_v48, 0.0  ;;  %v448_v55 = vmax.f32 %v384_v49, 0.0 }
 0x108   :  { %595 = vadd.xlane.f32.xlu1 %v594_v50  ;;  %v191_v57 = vpop.f32.mrf.mxu0  ;;  %v256_v59 = vpop.f32.mrf.mxu1 }
 0x109   :  { %v521_v60 = vmul.f32 %v1043_v2, %v447_v53  ;;  %v192_v63 = vadd.f32 %v191_v57, %v1026_v52  ;;  %v257_v0 = vadd.f32 %v256_v59, %v1031_v54  ;;  %v522_v1 = vmul.f32 %v1049_v8, %v448_v55 }
 0x10b   :  { %v449_v3 = vmax.f32 %v192_v63, 0.0  ;;  %v450_v4 = vmax.f32 %v257_v0, 0.0  ;;  %v598_v5 = vadd.f32 %v597_v51, %v521_v60 }
 0x10c   :  { %v321_v6 = vpop.f32.mrf.mxu2  ;;  %v386_v7 = vpop.f32.mrf.mxu3 }
 0x10d   :  { %v523_v9 = vmul.f32 %v1033_v56, %v449_v3  ;;  %v524_v10 = vmul.f32 %v1039_v61, %v450_v4  ;;  %v322_v11 = vadd.f32 %v321_v6, %v1035_v58  ;;  %v387_v12 = vadd.f32 %v386_v7, %v1041_v62  ;;  %v611_v62 = vpop.permute.xlu0 %610 }
 0x10e   :  { %v599_v13 = vadd.f32 %v598_v5, %v522_v1  ;;  %v1173_v27 = vperm.slane %v611_v62, 0 }
 0x10f   :  { %v602_v14 = vadd.f32 %v524_v10, %v523_v9  ;;  %v451_v52 = vmax.f32 %v322_v11, 0.0  ;;  %v452_v15 = vmax.f32 %v387_v12, 0.0 }
 0x110   :  { %600 = vadd.xlane.f32.xlu2 %v599_v13 }
 0x111   :  { %v525_v54 = vmul.f32 %v1043_v2, %v451_v52  ;;  %v526_v16 = vmul.f32 %v1049_v8, %v452_v15  ;;  %v1175_v2 = vand.u32 127, %v646_v24 }
 0x113   :  { %v603_v17 = vadd.f32 %v602_v14, %v525_v54  ;;  %v649_v28 = vadd.s32 4294967288, %v1175_v2  ;;  %v653_v31 = vadd.s32 4294967280, %v1175_v2  ;;  %v657_v33 = vadd.s32 4294967272, %v1175_v2 }
 0x114   :  { %v661_v37 = vadd.s32 4294967264, %v1175_v2  ;;  %v665_v43 = vadd.s32 4294967256, %v1175_v2  ;;  %v669_v46 = vadd.s32 4294967248, %v1175_v2  ;;  %v673_v49 = vadd.s32 4294967240, %v1175_v2 }
 0x115   :  { %v604_v18 = vadd.f32 %v603_v17, %v526_v16  ;;  %v531_v8 = vpop.xlane.xlu0 %530  ;;  %v677_v53 = vadd.s32 4294967232, %v1175_v2  ;;  %v681_v60 = vadd.s32 4294967224, %v1175_v2  ;;  %v685_v1 = vadd.s32 4294967216, %v1175_v2 }
 0x116   :  { %v614_v30 = vadd.f32 %v1173_v27, %v531_v8  ;;  %v689_v7 = vadd.s32 4294967208, %v1175_v2  ;;  %v693_v12 = vadd.s32 4294967200, %v1175_v2  ;;  %v697_v15 = vadd.s32 4294967192, %v1175_v2 }
 0x117   :  { %605 = vadd.xlane.f32.xlu0 %v604_v18  ;;  %v701_v18 = vadd.s32 4294967184, %v1175_v2  ;;  %v705_v62 = vadd.s32 4294967176, %v1175_v2 }
 0x118   :  { %v648_v40 = vperm.slane %v614_v30, %v1175_v2 }
 0x11b   :  { %v536_v19 = vpop.xlane.xlu1 %535 }
 0x11c   :  { %v615_v29 = vadd.f32 %v1173_v27, %v536_v19 }
 0x11e   :  { %v650_v35 = vperm.slane %v615_v29, %v649_v28 }
 0x120   :  { %v652_v45 = vsel %vm651_vm1, %v650_v35, %v648_v40 }
 0x123   :  { %v541_v20 = vpop.xlane.xlu1 %540 }
 0x124   :  { %v616_v32 = vadd.f32 %v1173_v27, %v541_v20 }
 0x126   :  { %v654_v41 = vperm.slane %v616_v32, %v653_v31 }
 0x128   :  { %v656_v51 = vsel %vm655_vm2, %v654_v41, %v652_v45 }
 0x12b   :  { %v546_v56 = vpop.xlane.xlu2 %545 }
 0x12c   :  { %v617_v34 = vadd.f32 %v1173_v27, %v546_v56 }
 0x12e   :  { %v658_v42 = vperm.slane %v617_v34, %v657_v33 }
 0x130   :  { %v660_v57 = vsel %vm659_vm3, %v658_v42, %v656_v51 }
 0x133   :  { %v551_v61 = vpop.xlane.xlu2 %550 }
 0x134   :  { %v618_v38 = vadd.f32 %v1173_v27, %v551_v61 }
 0x136   :  { %v662_v48 = vperm.slane %v618_v38, %v661_v37 }
 0x138   :  { %v664_v5 = vsel %vm663_vm4, %v662_v48, %v660_v57 }
 0x13b   :  { %v556_v21 = vpop.xlane.xlu1 %555 }
 0x13c   :  { %v619_v44 = vadd.f32 %v1173_v27, %v556_v21 }
 0x13e   :  { %v666_v59 = vperm.slane %v619_v44, %v665_v43 }
 0x140   :  { %v668_v14 = vsel %vm667_vm5, %v666_v59, %v664_v5 }
 0x143   :  { %v561_v58 = vpop.xlane.xlu2 %560 }
 0x144   :  { %v620_v47 = vadd.f32 %v1173_v27, %v561_v58 }
 0x146   :  { %v670_v0 = vperm.slane %v620_v47, %v669_v46 }
 0x148   :  { %v672_v16 = vsel %vm671_vm6, %v670_v0, %v668_v14 }
 0x14b   :  { %v566_v22 = vpop.xlane.xlu1 %565 }
 0x14c   :  { %v621_v50 = vadd.f32 %v1173_v27, %v566_v22 }
 0x14e   :  { %v674_v6 = vperm.slane %v621_v50, %v673_v49 }
 0x150   :  { %v676_v56 = vsel %vm675_vm7, %v674_v6, %v672_v16 }
 0x153   :  { %v571_v23 = vpop.xlane.xlu2 %570 }
 0x154   :  { %v622_v55 = vadd.f32 %v1173_v27, %v571_v23 }
 0x156   :  { %v678_v11 = vperm.slane %v622_v55, %v677_v53 }
 0x158   :  { %v680_v61 = vsel %vm679_vm8, %v678_v11, %v676_v56 }
 0x15b   :  { %v576_v25 = vpop.xlane.xlu1 %575 }
 0x15c   :  { %v623_v63 = vadd.f32 %v1173_v27, %v576_v25 }
 0x15e   :  { %v682_v52 = vperm.slane %v623_v63, %v681_v60 }
 0x160   :  { %v684_v58 = vsel %vm683_vm9, %v682_v52, %v680_v61 }
 0x163   :  { %v581_v26 = vpop.xlane.xlu2 %580 }
 0x164   :  { %v624_v3 = vadd.f32 %v1173_v27, %v581_v26 }
 0x166   :  { %v686_v17 = vperm.slane %v624_v3, %v685_v1 }
 0x168   :  { %v688_v23 = vsel %vm687_vm10, %v686_v17, %v684_v58 }
 0x16b   :  { %v586_v36 = vpop.xlane.xlu1 %585 }
 0x16c   :  { %v625_v9 = vadd.f32 %v1173_v27, %v586_v36 }
 0x16e   :  { %v690_v20 = vperm.slane %v625_v9, %v689_v7 }
 0x170   :  { %v692_v26 = vsel %vm691_vm11, %v690_v20, %v688_v23 }
 0x173   :  { %v591_v39 = vpop.xlane.xlu2 %590 }
 0x174   :  { %v626_v13 = vadd.f32 %v1173_v27, %v591_v39 }
 0x176   :  { %v694_v21 = vperm.slane %v626_v13, %v693_v12 }
 0x178   :  { %v696_v28 = vsel %vm695_vm12, %v694_v21, %v692_v26 }
 0x17b   :  { %v596_v4 = vpop.xlane.xlu1 %595 }
 0x17c   :  { %v627_v54 = vadd.f32 %v1173_v27, %v596_v4 }
 0x17e   :  { %v698_v22 = vperm.slane %v627_v54, %v697_v15 }
 0x180   :  { %v700_v29 = vsel %vm699_vm13, %v698_v22, %v696_v28 }
 0x183   :  { %v601_v10 = vpop.xlane.xlu2 %600 }
 0x184   :  { %v628_v19 = vadd.f32 %v1173_v27, %v601_v10 }
 0x186   :  { %v702_v24 = vperm.slane %v628_v19, %v701_v18 }
 0x188   :  { %v704_v31 = vsel %vm703_vm14, %v702_v24, %v700_v29 }
 0x18a   :  { %v606_v25 = vpop.xlane.xlu0 %605 }
 0x18b   :  { %v629_v8 = vadd.f32 %v1173_v27, %v606_v25 }
 0x18d   :  { %v706_v30 = vperm.slane %v629_v8, %v705_v62 }
 0x18f   :  { %v708_v32 = vsel %vm707_vm15, %v706_v30, %v704_v31 }
 0x190   :  { %710 = vst [vmem:[%s1224_s5] sm:$0x1] %v708_v32 }

</bundles_post_ra>
